<compile_context>
chip_gen: v7x
topology: tpu7x:2x2x1
jax: 0.10.0
libtpu: 0.0.40
codegen_flags: <defaults>
</compile_context>

<pallas_src>
import jax
import jax.numpy as jnp
from jax import lax
from jax.experimental import pallas as pl
from jax.experimental.pallas import tpu as pltpu


def _round_up(x, m):
    return (x + m - 1) // m * m


def ode_mlp_kernel(t_ref, h_ref, p_ref, o_ref):
    """One lane-block of time points, all B samples.

    t_ref: (1, blk)    VMEM  -- time points, one per lane
    h_ref: (2*B,)      SMEM  -- flattened states [h[0,0], h[0,1], h[1,0], ...]
    p_ref: (H, 8)      VMEM  -- packed params: cols 0..2 = W1^T, col 3 = b1,
                                cols 4..5 = W2, rows 0..1 of col 6 = b2
    o_ref: (B, 2, blk) VMEM  -- out[b, f, n] = net([h_b, t_n])[f]
    """
    H = p_ref.shape[0]
    B = o_ref.shape[0]
    blk = t_ref.shape[1]

    t_row = t_ref[...]                                   # (1, blk)

    w1c0 = p_ref[:, 0:1]                                 # (H, 1) = W1[0, :]
    w1c1 = p_ref[:, 1:2]                                 # (H, 1) = W1[1, :]
    w1c2 = p_ref[:, 2:3]                                 # (H, 1) = W1[2, :]
    b1 = p_ref[:, 3:4]                                   # (H, 1)
    b2 = p_ref[0:2, 6:7]                                 # (2, 1)

    # Hoisted ONCE per grid step (shared by all B samples): the t-dependent
    # part of layer 1, e[j, n] = W1[2, j] * t[n] + b1[j]  (outer product+bias).
    e = w1c2 * t_row + b1                                # (H, blk)

    # Hoisted full-lane-width copies of the two W2 columns so the per-sample
    # loop does no implicit (H,1)->(H,blk) lane splats for them.
    w2c0_f = jnp.broadcast_to(p_ref[:, 4:5], (H, blk))   # (H, blk)
    w2c1_f = jnp.broadcast_to(p_ref[:, 5:6], (H, blk))   # (H, blk)

    def per_sample(b, carry):
        # ODE-state components are scalars read straight from SMEM -> no
        # sublane broadcast of an h row is needed at all.
        h0 = h_ref[2 * b]
        h1 = h_ref[2 * b + 1]
        # Layer 1: z = W1^T @ [h0, h1, t] + b1.  The t/bias part is the
        # hoisted `e`; the per-sample part is a tiny (H, 1) FMA + one add.
        s = w1c0 * h0 + w1c1 * h1                        # (H, 1)
        # jnp.tanh lowers to the EUP transcendental slot (free vs. the VALU);
        # if it ever expanded to a VALU composition, rewrite via exp(2x) and
        # pl.reciprocal(approx=True).
        a = jnp.tanh(s + e)                              # (H, blk)
        # Layer 2: a @ W2 + b2 as two weighted cross-sublane reductions
        # (VPU mul + XLU sum) -- no MXU push for a 32->2 contraction.
        o0 = jnp.sum(a * w2c0_f, axis=0, keepdims=True)  # (1, blk)
        o1 = jnp.sum(a * w2c1_f, axis=0, keepdims=True)  # (1, blk)
        # Single lane-dense (2, blk) store per sample (instead of two 1-row
        # masked stores).
        o_ref[b] = jnp.concatenate([o0, o1], axis=0) + b2
        return carry

    # Real scf.for so per-sample (H, blk) intermediates have bounded live
    # ranges (keeps VMEM footprint flat even for large lane blocks).
    lax.fori_loop(0, B, per_sample, 0)


def time_varying_ode_func_fused(t_grid, h, w1, b1, w2, b2, *, block_t=8192):
    """Evaluate the ODE func at every (t_n, h_b) pair.

    Returns the kernel-native layout (B, 2, T): out[b, f, n].  (No transpose
    on the return path; transpose in the consumer only if it really needs a
    time-major view.)
    """
    t_grid = jnp.asarray(t_grid, jnp.float32).reshape(-1)
    h = jnp.asarray(h, jnp.float32)
    w1 = jnp.asarray(w1, jnp.float32)
    b1 = jnp.asarray(b1, jnp.float32)
    w2 = jnp.asarray(w2, jnp.float32)
    b2 = jnp.asarray(b2, jnp.float32)

    T = t_grid.shape[0]
    B, d_in = h.shape
    H = w1.shape[1]
    assert d_in == 2 and w1.shape == (3, H) and w2.shape == (H, 2)
    assert b1.shape == (H,) and b2.shape == (2,)

    # --- lane block over time points ----------------------------------------
    block_t = max(128, _round_up(block_t, 128))
    T_pad = _round_up(T, 128)
    blk = min(block_t, T_pad)
    # v7x megacore: make sure the "parallel" grid axis has >= 2 steps so both
    # TensorCores get work whenever there is enough to split.
    if T_pad // blk < 2 and T_pad >= 256:
        blk = _round_up(T_pad // 2, 128)
    T_pad = _round_up(T_pad, blk)

    # Only wrapper-side prep (tiny): pad t onto full lanes and flatten h for
    # SMEM.  No (3, T*B) input tensor is materialized; the (t, h) pairing
    # happens inside the kernel.
    t_lanes = jnp.pad(t_grid, (0, T_pad - T)).reshape(1, T_pad)
    h_flat = h.reshape(-1)                               # (2B,)

    # --- pack all parameters into one (H, 8) f32 slab (single resident DMA) -
    slab = jnp.zeros((H, 8), jnp.float32)
    slab = slab.at[:, 0:3].set(w1.T)
    slab = slab.at[:, 3].set(b1)
    slab = slab.at[:, 4:6].set(w2)
    slab = slab.at[0:2, 6].set(b2)

    grid = (T_pad // blk,)
    out = pl.pallas_call(
        ode_mlp_kernel,
        out_shape=jax.ShapeDtypeStruct((B, 2, T_pad), jnp.float32),
        grid=grid,
        in_specs=[
            pl.BlockSpec((1, blk), lambda i: (0, i)),               # t lanes
            pl.BlockSpec(memory_space=pltpu.MemorySpace.SMEM),      # h scalars
            pl.BlockSpec((H, 8), lambda i: (0, 0)),                 # params
        ],
        out_specs=pl.BlockSpec((B, 2, blk), lambda i: (0, 0, i)),
        compiler_params=pltpu.CompilerParams(
            dimension_semantics=("parallel",),
            vmem_limit_bytes=32 * 1024 * 1024,   # explicit headroom for v5e
        ),
    )(t_lanes, h_flat, slab)

    return out[:, :, :T]                                 # (B, 2, T)


def time_varying_ode_func(t_scalar, h, w1, b1, w2, b2):
    """Exact equivalent of the module's forward(t, h): h (B, 2) -> (B, 2).

    Note: a single-scalar call uses one lane of a 128-lane block; ODE
    integrators should batch time points through the fused path when possible.
    """
    t1 = jnp.reshape(jnp.asarray(t_scalar, jnp.float32), (1,))
    return time_varying_ode_func_fused(t1, h, w1, b1, w2, b2)[:, :, 0]


def _reference(t_scalar, h, w1, b1, w2, b2):
    t_ = t_scalar * jnp.ones_like(h[..., :1])
    inp = jnp.concatenate([h, t_], axis=-1)
    return jnp.tanh(inp @ w1 + b1) @ w2 + b2


if __name__ == "__main__":
    key = jax.random.PRNGKey(0)
    k_h, k_w1, k_b1, k_w2, k_b2 = jax.random.split(key, 5)

    B = 8  # batch of ODE states, each 2-dimensional
    h = jax.random.normal(k_h, (B, 2), dtype=jnp.float32)

    # Deterministic init matching torch.nn.Linear default ranges; stored [in, out].
    lim1 = 1.0 / jnp.sqrt(3.0)
    lim2 = 1.0 / jnp.sqrt(32.0)
    w1 = jax.random.uniform(k_w1, (3, 32), jnp.float32, -lim1, lim1)
    b1 = jax.random.uniform(k_b1, (32,), jnp.float32, -lim1, lim1)
    w2 = jax.random.uniform(k_w2, (32, 2), jnp.float32, -lim2, lim2)
    b2 = jax.random.uniform(k_b2, (2,), jnp.float32, -lim2, lim2)

    # t = torch.linspace(0, 7, 160): evaluate the ODE func at ALL time points
    # in a single fused pallas_call (grid of 2 parallel lane blocks).
    t_grid = jnp.linspace(0.0, 7.0, 160)

    fused = jax.jit(time_varying_ode_func_fused)
    out_all = jax.block_until_ready(fused(t_grid, h, w1, b1, w2, b2))
    assert out_all.shape == (B, 2, 160)

    ref_all = jax.vmap(lambda tt: _reference(tt, h, w1, b1, w2, b2))(t_grid)  # (T,B,2)
    ref_native = jnp.transpose(ref_all, (1, 2, 0))                            # (B,2,T)
    assert jnp.allclose(out_all, ref_native, atol=1e-5, rtol=1e-5)

    # Single (t, h) call — same semantics/layout as the module's forward().
    t_scalar = t_grid[37]
    out_one = jax.block_until_ready(
        time_varying_ode_func(t_scalar, h, w1, b1, w2, b2))
    assert out_one.shape == (B, 2)
    assert jnp.allclose(out_one, _reference(t_scalar, h, w1, b1, w2, b2),
                        atol=1e-5, rtol=1e-5)

    print("KERNEL_OK")
</pallas_src>

<mosaic_0001>
module attributes {stable_mosaic.version = 11 : i64} {
  func.func @ode_mlp_kernel(%arg0: i32, %arg1: memref<1x128xf32, #tpu.memory_space<vmem>>, %arg2: memref<16xf32, #tpu.memory_space<smem>>, %arg3: memref<32x8xf32, #tpu.memory_space<vmem>>, %arg4: memref<8x2x128xf32, #tpu.memory_space<vmem>>) attributes {dimension_semantics = [#tpu.dimension_semantics<parallel>], iteration_bounds = array<i64: 2>, scalar_prefetch = 0 : i64, scratch_operands = 0 : i64, tpu.core_type = #tpu.core_type<tc>, window_params = [{transform_indices = @transform_0, window_bounds = array<i64: 1, 128>}, {transform_indices = @transform_1, window_bounds = array<i64: 16>}, {pipeline_mode = #tpu.pipeline_mode<synchronous>, transform_indices = @transform_2, window_bounds = array<i64: 32, 8>}, {transform_indices = @transform_3, window_bounds = array<i64: 8, 2, 128>}]} {
    %c0 = arith.constant 0 : index
    %c0_0 = arith.constant 0 : index
    %0 = vector.load %arg1[%c0, %c0_0] : memref<1x128xf32, #tpu.memory_space<vmem>>, vector<1x128xf32>
    %c0_1 = arith.constant 0 : index
    %c0_2 = arith.constant 0 : index
    %1 = vector.load %arg3[%c0_1, %c0_2] : memref<32x8xf32, #tpu.memory_space<vmem>>, vector<32x1xf32>
    %c0_3 = arith.constant 0 : index
    %c1 = arith.constant 1 : index
    %2 = vector.load %arg3[%c0_3, %c1] : memref<32x8xf32, #tpu.memory_space<vmem>>, vector<32x1xf32>
    %c0_4 = arith.constant 0 : index
    %c2 = arith.constant 2 : index
    %3 = vector.load %arg3[%c0_4, %c2] : memref<32x8xf32, #tpu.memory_space<vmem>>, vector<32x1xf32>
    %c0_5 = arith.constant 0 : index
    %c3 = arith.constant 3 : index
    %4 = vector.load %arg3[%c0_5, %c3] : memref<32x8xf32, #tpu.memory_space<vmem>>, vector<32x1xf32>
    %c0_6 = arith.constant 0 : index
    %c6 = arith.constant 6 : index
    %5 = vector.load %arg3[%c0_6, %c6] : memref<32x8xf32, #tpu.memory_space<vmem>>, vector<2x1xf32>
    %6 = vector.broadcast %3 : vector<32x1xf32> to vector<32x128xf32>
    %7 = vector.broadcast %0 : vector<1x128xf32> to vector<32x128xf32>
    %8 = arith.mulf %6, %7 : vector<32x128xf32>
    %9 = vector.broadcast %4 : vector<32x1xf32> to vector<32x128xf32>
    %10 = arith.addf %8, %9 : vector<32x128xf32>
    %c0_7 = arith.constant 0 : index
    %c4 = arith.constant 4 : index
    %11 = vector.load %arg3[%c0_7, %c4] : memref<32x8xf32, #tpu.memory_space<vmem>>, vector<32x1xf32>
    %12 = vector.shape_cast %11 : vector<32x1xf32> to vector<32x1xf32>
    %13 = vector.broadcast %12 : vector<32x1xf32> to vector<32x128xf32>
    %c0_8 = arith.constant 0 : index
    %c5 = arith.constant 5 : index
    %14 = vector.load %arg3[%c0_8, %c5] : memref<32x8xf32, #tpu.memory_space<vmem>>, vector<32x1xf32>
    %15 = vector.shape_cast %14 : vector<32x1xf32> to vector<32x1xf32>
    %16 = vector.broadcast %15 : vector<32x1xf32> to vector<32x128xf32>
    %c0_i32 = arith.constant 0 : i32
    %c8_i32 = arith.constant 8 : i32
    %17 = arith.addi %c0_i32, %c8_i32 : i32
    %c1_i32 = arith.constant 1 : i32
    scf.for %arg5 = %c0_i32 to %17 step %c1_i32  : i32 {
      %c2_i32 = arith.constant 2 : i32
      %18 = arith.muli %c2_i32, %arg5 : i32
      %19 = arith.index_cast %18 : i32 to index
      %20 = memref.load %arg2[%19] : memref<16xf32, #tpu.memory_space<smem>>
      %c2_i32_10 = arith.constant 2 : i32
      %21 = arith.muli %c2_i32_10, %arg5 : i32
      %c1_i32_11 = arith.constant 1 : i32
      %22 = arith.addi %21, %c1_i32_11 : i32
      %23 = arith.index_cast %22 : i32 to index
      %24 = memref.load %arg2[%23] : memref<16xf32, #tpu.memory_space<smem>>
      %25 = vector.broadcast %20 : f32 to vector<32x1xf32>
      %26 = arith.mulf %1, %25 : vector<32x1xf32>
      %27 = vector.broadcast %24 : f32 to vector<32x1xf32>
      %28 = arith.mulf %2, %27 : vector<32x1xf32>
      %29 = arith.addf %26, %28 : vector<32x1xf32>
      %30 = vector.broadcast %29 : vector<32x1xf32> to vector<32x128xf32>
      %31 = arith.addf %30, %10 : vector<32x128xf32>
      %32 = math.tanh %31 : vector<32x128xf32>
      %33 = arith.mulf %32, %13 : vector<32x128xf32>
      %cst = arith.constant dense<0.000000e+00> : vector<128xf32>
      %34 = vector.multi_reduction <add>, %33, %cst [0] : vector<32x128xf32> to vector<128xf32>
      %35 = vector.shape_cast %34 : vector<128xf32> to vector<1x128xf32>
      %36 = arith.mulf %32, %16 : vector<32x128xf32>
      %cst_12 = arith.constant dense<0.000000e+00> : vector<128xf32>
      %37 = vector.multi_reduction <add>, %36, %cst_12 [0] : vector<32x128xf32> to vector<128xf32>
      %38 = vector.shape_cast %37 : vector<128xf32> to vector<1x128xf32>
      %39 = tpu.concatenate %35, %38 in 0 : vector<1x128xf32>, vector<1x128xf32> -> vector<2x128xf32>
      %40 = vector.broadcast %5 : vector<2x1xf32> to vector<2x128xf32>
      %41 = arith.addf %39, %40 : vector<2x128xf32>
      %42 = arith.index_cast %arg5 : i32 to index
      %c0_13 = arith.constant 0 : index
      %c0_14 = arith.constant 0 : index
      %43 = vector.load %arg4[%42, %c0_13, %c0_14] : memref<8x2x128xf32, #tpu.memory_space<vmem>>, vector<1x2x128xf32>
      %44 = vector.shape_cast %43 : vector<1x2x128xf32> to vector<2x128xf32>
      %45 = vector.shape_cast %41 : vector<2x128xf32> to vector<1x2x128xf32>
      tpu.vector_store %arg4[%42, %c0_13, %c0_14], %45 {strides = array<i32>} : memref<8x2x128xf32, #tpu.memory_space<vmem>>, vector<1x2x128xf32>,
    }
    %c8_i32_9 = arith.constant 8 : i32
    return
  }
  func.func @transform_0(%arg0: i32) -> (i32, i32) {
    %c0_i32 = arith.constant 0 : i32
    %c0_i32_0 = arith.constant 0 : i32
    return %c0_i32, %arg0 : i32, i32
  }
  func.func @transform_1(%arg0: i32) -> i32 {
    %c0_i32 = arith.constant 0 : i32
    %c0_i32_0 = arith.constant 0 : i32
    return %c0_i32 : i32
  }
  func.func @transform_2(%arg0: i32) -> (i32, i32) {
    %c0_i32 = arith.constant 0 : i32
    %c0_i32_0 = arith.constant 0 : i32
    %c0_i32_1 = arith.constant 0 : i32
    return %c0_i32, %c0_i32_0 : i32, i32
  }
  func.func @transform_3(%arg0: i32) -> (i32, i32, i32) {
    %c0_i32 = arith.constant 0 : i32
    %c0_i32_0 = arith.constant 0 : i32
    %c0_i32_1 = arith.constant 0 : i32
    return %c0_i32, %c0_i32_0, %arg0 : i32, i32, i32
  }
}

</mosaic_0001>

<bundles_post_ra>
// kernel: time_varying_ode_func_fused.1
= control target key start
LH: loop header
LB: loop body
LE: loop exit
PB: predicated region body
PF: predicated region fallthrough
CT: control target
= control target key end

     0   :  { %8 = vsyncpa [#allocation4], 0  ;;  %s916_s0 = inlined_call_operand.vmem [shape: f32[1,256], index: 0, kind: input, shape index: {}]   ;;  %s917_s1 = inlined_call_operand.vmem [shape: f32[16], index: 1, kind: input, shape index: {}]   ;;  %s918_s2 = inlined_call_operand.vmem [shape: f32[32,8], index: 2, kind: input, shape index: {}]   ;;  %s919_s3 = inlined_call_operand.hbm [shape: f32[8,2,256], index: 3, kind: output, shape index: {}]  }
   0x1   :  { %9 = vsyncpa [#allocation3], 0 }
   0x2   :  { %11 = vsyncpa [#allocation3 + $0x1], 0  ;;  %s684_s12 = smov 0   ;;  %s686_s13 = smov 0  }
   0x3   :  { %s688_s14 = smov 0   ;;  %s690_s15 = smov 0  }
   0x4 LB: > { %s705_s16 = sadd.s32 4294967295, %s646_s15   ;;  %s460_s17 = sadd.s32 4294967294, %s646_s15   ;;  %s646_s15 = sphi %s690_s15, %s926_s15   ;;  %s642_s14 = sphi %s688_s14, %s925_s14   ;;  %s638_s13 = sphi %s686_s13, %s924_s13   ;;  %s634_s12 = sphi %s684_s12, %s923_s12  }
   0x5   : > { %s709_s18 = sadd.s32 1, %s646_s15   ;;  %s92_s19 = sadd.s32 1, %s642_s14 }
   0x6   : > { %s89_s20 = ssub.s32 %s646_s15, %s709_s18  ;;  %p102_p0 = scmp.ne.s32.totalorder %s642_s14, %s638_s13 }
   0x7   : > { %p90_p1 = scmp.eq.s32.totalorder %s89_s20, 0  ;;  %p103_p2 = scmp.eq.s32.totalorder %s705_s16, 1 }
   0x8   : > { %p108_p3 = scmp.ne.s32.totalorder %s638_s13, %s634_s12  ;;  %p109_p4 = scmp.eq.s32.totalorder %s460_s17, 1 }
   0x9   : > { %s720_s21 = scalar_select %p90_p1, %s642_s14, %s92_s19  }
   0xa   : > { %p722_p5 = por %p103_p2, %p102_p0  ;;  %p726_p6 = por %p109_p4, %p108_p3 }
   0xb   : > { %p461_p7 = scmp.ge.s32.totalorder %s646_s15, 1  ;;  %p116_p8 = scmp.lt.s32.totalorder %s646_s15, 3 }
   0xc   : > { %p487_p9 = scmp.eq.s32.totalorder %s705_s16, 0  ;;  %s129_s27 = sshll.u32 %s917_s1, 4  ;;  %s130_s27 = int_to_ptr.vmem [resolvable:$true] %s129_s27 }
   0xd   : > { %p733_p10 = pnand %p461_p7, %p116_p8  ;;  %s561_s28 = scalar_lea.vmem %s130_s27, 16 }
   0xe   : > { %p562_p13 = scmp.ne.s32.totalorder %s130_s27, %s561_s28  ;;  %p569_p3 = scmp.lt.s32.totalorder %s130_s27, %s130_s27 }
   0xf   : > { %p479_p11 = pneg %p733_p10  ;;  %p570_p4 = scmp.lt.s32.totalorder %s561_s28, %s561_s28 }
  0x11   : > { %p480_p12 = pnand %p487_p9, %p479_p11  ;;  %p571_p7 = por %p570_p4, %p569_p3 }
  0x13   : > { %p563_p0 = pneg %p480_p12 }
  0x15   : > { %p564_p1 = pnand %p563_p0, %p562_p13 }
  0x17   : > { %p565_p2 = pneg %p564_p1 }
  0x19   : > { %p572_p8 = pnand %p571_p7, %p565_p2 }
  0x1b   : > { %575 = shalt.err (!%p572_p8)
}
  0x1c   : > { %s652_s29 = smov [#allocation2]   ;;  %151 = sbr.rel (%p733_p10) target bundleno = 517 (0x205), region = 32 }
  0x1d   : > { %482 = dma.vmem_to_smem (!%p480_p12), %s130_s27, 16, %s652_s29, [#allocation4]  }
  0x23   : > { %625 = dma.done.wait (%p487_p9), [#allocation4], 16  }
  0x24   : > { %627 = vsyncadd (%p487_p9), [#allocation4], 4294967280 }
  0x25   : > { %157 = sfence }
  0x26   : > { %v753_v0 = vld [vmem:[%s918_s2 + $0x10] sm:$0xff]  ;;  %v758_v1 = vld [vmem:[%s918_s2] sm:$0xff]  ;;  %v653_v2 = vmov 2   ;;  %v765_v3 = vld [vmem:[%s918_s2 + $0x18] sm:$0xff]  ;;  %v654_v5 = vmov 3   ;;  %v655_v6 = vmov 4  }
  0x27   : > { %542 = vset.pattern.permute.xlu1 %v653_v2  ;;  %541 = vset.pattern.permute.xlu0 %v653_v2  ;;  %v770_v4 = vld [vmem:[%s918_s2 + $0x8] sm:$0xff]  ;;  %v656_v7 = vmov 5   ;;  %s171_s11 = sand.u32 1, %s638_s13   ;;  %v793_v8 = vld [vmem:[%s918_s2] sm:$0x3]  ;;  %p174_p9 = scmp.lt.s32.totalorder %s705_s16, 1 }
  0x28   : > { %195 = vperm.xlu1 %542, %v753_v0   ;;  %185 = vperm.xlu0 %541, %v758_v1   ;;  %s788_s17 = sshll.u32 %s171_s11, 4  ;;  %s826_s29 = smov 0  }
  0x29   : > { %s175_s24 = scalar_select %p174_p9, %s705_s16, 1 }
  0x2a   : > { %s173_s28 = scalar_lea.vmem [#allocation5], %s788_s17 }
  0x2b   : > { %s176_s27 = scalar_lea.vmem %s916_s0, %s175_s24 }
  0x2c   : > { %200 = vperm.xlu1 %542, %v765_v3   ;;  %190 = vperm.xlu0 %541, %v770_v4   ;;  %v467_v13 = vld [vmem:[%s176_s27] ss:$0 sm:$0xff] }
  0x30   : > { %544 = vset.pattern.permute.xlu1 %v654_v5  ;;  %543 = vset.pattern.permute.xlu0 %v654_v5 }
  0x31   : > { %218 = vperm.xlu1 %544, %v770_v4   ;;  %214 = vperm.xlu0 %543, %v758_v1  }
  0x35   : > { %222 = vperm.xlu1 %544, %v753_v0   ;;  %226 = vperm.xlu0 %543, %v765_v3  }
  0x39   : > { %545 = vset.pattern.permute.xlu1 %v655_v6  ;;  %546 = vset.pattern.permute.xlu0 %v655_v6 }
  0x3a   : > { %234 = vperm.xlu1 %545, %v758_v1   ;;  %238 = vperm.xlu0 %546, %v770_v4  }
  0x3e   : > { %242 = vperm.xlu1 %545, %v753_v0   ;;  %547 = vset.pattern.permute.xlu0 %v656_v7 }
  0x3f   : > { %250 = vperm.xlu0 %547, %v758_v1  }
  0x42   : > { %246 = vperm.xlu1 %545, %v765_v3  }
  0x43   : > { %262 = vperm.xlu0 %547, %v765_v3  }
  0x46   : > { %548 = vset.pattern.permute.xlu1 %v656_v7 }
  0x47   : > { %254 = vperm.xlu1 %548, %v770_v4  }
  0x4b   : > { %258 = vperm.xlu1 %548, %v753_v0  }
  0xa7   : > { %v196_v9 = vpop.permute.xlu1 %195  ;;  %v186_v10 = vpop.permute.xlu0 %185 }
  0xa8   : > { %v209_v14 = vmul.f32 %v467_v13, %v186_v10  ;;  %v211_v20 = vmul.f32 %v467_v13, %v196_v9 }
  0xab   : > { %v201_v11 = vpop.permute.xlu1 %200  ;;  %v191_v12 = vpop.permute.xlu0 %190 }
  0xac   : > { %v210_v15 = vmul.f32 %v467_v13, %v191_v12  ;;  %v212_v21 = vmul.f32 %v467_v13, %v201_v11 }
  0xb0   : > { %v219_v16 = vpop.permute.xlu1 %218  ;;  %v215_v17 = vpop.permute.xlu0 %214 }
  0xb1   : > { %v801_v18 = vadd.f32 %v219_v16, %v210_v15  ;;  %v803_v19 = vadd.f32 %v215_v17, %v209_v14 }
  0xb4   : > { %v223_v22 = vpop.permute.xlu1 %222  ;;  %v227_v23 = vpop.permute.xlu0 %226 }
  0xb5   : > { %v805_v24 = vadd.f32 %v223_v22, %v211_v20  ;;  %v807_v25 = vadd.f32 %v227_v23, %v212_v21 }
  0xb9   : > { %v809_v26 = vpop.permute.xlu1 %234  ;;  %v811_v27 = vpop.permute.xlu0 %238 }
  0xbd   : > { %v813_v28 = vpop.permute.xlu1 %242 }
  0xbe   : > { %v815_v29 = vpop.permute.xlu0 %250 }
  0xc1   : > { %v817_v30 = vpop.permute.xlu1 %246 }
  0xc2   : > { %v819_v31 = vpop.permute.xlu0 %262 }
  0xc6   : > { %v821_v32 = vpop.permute.xlu1 %254 }
  0xca   : > { %v823_v33 = vpop.permute.xlu1 %258 }
  0xcb LB: >> { %v657_v34 = vmov 0   ;;  %s832_s30 = sshll.u32 %s650_s29, 1  ;;  %s658_s6 = smov 127   ;;  %v659_v53 = vmov 6   ;;  %vm359_vm0 = vcmask 1040384   ;;  %s650_s29 = sphi %s826_s29, %s270_s29  }
  0xcc   : >> { %549 = vset.pattern.permute.xlu0 %v657_v34  ;;  %550 = vset.pattern.permute.xlu1 %v657_v34  ;;  %s273_s4 = sadd.s32 1, %s832_s30  ;;  %s272_s7 = sld [smem:[#allocation2 + %s832_s30]] }
  0xcd   : >> { %s274_s5 = sld [smem:[#allocation2 + %s273_s4]]  ;;  %s367_s8 = scalar_lea.vmem %s173_s28, %s832_s30 [#allocation5] }
  0xce   : >> { %s270_s29 = sadd.s32 1, %s650_s29  }
  0xcf   : >> { %p267_p10 = scmp.ge.s32.totalorder %s270_s29, 8  }
  0xd0   : > { %s470_s9 = sshll.u32 (%p267_p10), %s705_s16, 5  ;;  %s382_s24 = sshll.u32 (%p267_p10), %s173_s28, 4  ;;  %s871_s24 = int_to_ptr.vmem [resolvable:$true] %s382_s24 }
  0xd1   : > { %s867_s20 = scalar_lea.hbm (%p267_p10), %s919_s3, %s470_s9  ;;  %s875_s25 = scalar_lea.sflag (%p267_p10), [#allocation3], %s171_s11 }
  0xd2   : >> { %v275_v40 = vstv %s272_s7  ;;  %s576_s26 = scalar_lea.vmem (%p267_p10), %s871_s24, 256  ;;  %s660_s16 = smov (%p267_p10), [#allocation5]  }
  0xd3   : >> { %v280_v35 = vstv %s274_s5  ;;  %v276_v41 = vmul.f32 %v275_v40, %v758_v1  ;;  %v277_v45 = vmul.f32 %v275_v40, %v770_v4  ;;  %v279_v46 = vmul.f32 %v275_v40, %v765_v3  ;;  %p577_p11 = scmp.ne.s32.totalorder (%p267_p10), %s871_s24, %s576_s26  ;;  %s580_s27 = sshll.u32 (%p267_p10), %s660_s16, 4  ;;  %s581_s27 = int_to_ptr.vmem [resolvable:$false] %s580_s27 }
  0xd4   : >> { %v281_v36 = vmul.f32 %v280_v35, %v758_v1  ;;  %v283_v37 = vmul.f32 %v280_v35, %v753_v0  ;;  %v282_v38 = vmul.f32 %v280_v35, %v770_v4  ;;  %v284_v39 = vmul.f32 %v280_v35, %v765_v3  ;;  %s582_s29 = scalar_lea.vmem (%p267_p10), %s581_s27, 512  ;;  %p583_p0 = scmp.lt.s32.totalorder (%p267_p10), %s871_s24, %s581_s27 }
  0xd5   : >> { %v278_v49 = vmul.f32 %v275_v40, %v753_v0  ;;  %p578_p12 = pnand (%p267_p10), %p577_p11, %p722_p5  ;;  %p584_p1 = scmp.lt.s32.totalorder (%p267_p10), %s582_s29, %s576_s26 }
  0xd6   : >> { %289 = vrot.lane.b32.xlu0 %v281_v36, %s658_s6  ;;  %293 = vrot.lane.b32.xlu1 %v283_v37, %s658_s6 }
  0xd7   : > { %p579_p13 = pneg (%p267_p10), %p578_p12  ;;  %p585_p2 = por (%p267_p10), %p584_p1, %p583_p0 }
  0xd9   : > { %p586_p3 = pnand (%p267_p10), %p585_p2, %p579_p13 }
  0xda   : >> { %291 = vrot.lane.b32.xlu0 %v282_v38, %s658_s6  ;;  %295 = vrot.lane.b32.xlu1 %v284_v39, %s658_s6 }
 0x148   : >> { %v290_v42 = vpop.permute.xlu0 %289  ;;  %v294_v43 = vpop.permute.xlu1 %293 }
 0x149   : >> { %v301_v44 = vadd.f32 %v290_v42, %v276_v41  ;;  %v303_v52 = vadd.f32 %v294_v43, %v278_v49 }
 0x14b   : >> { %307 = vperm.xlu0 %549, %v301_v44  }
 0x14c   : >> { %v292_v47 = vpop.permute.xlu0 %291  ;;  %v296_v48 = vpop.permute.xlu1 %295 }
 0x14d   : >> { %v302_v50 = vadd.f32 %v292_v47, %v277_v45  ;;  %v304_v51 = vadd.f32 %v296_v48, %v279_v46 }
 0x14f   : >> { %312 = vperm.xlu1 %550, %v302_v50   ;;  %322 = vperm.xlu0 %549, %v304_v51  }
 0x153   : >> { %317 = vperm.xlu1 %550, %v303_v52   ;;  %552 = vset.pattern.permute.xlu0 %v659_v53 }
 0x157   : >> { %551 = vset.pattern.permute.xlu1 %v659_v53 }
 0x158   : >> { %363 = vperm.xlu1 %551, %v793_v8  }
 0x1ca   : >> { %v308_v54 = vpop.permute.xlu0 %307 }
 0x1cb   : >> { %v325_v55 = vadd.f32 %v308_v54, %v803_v19 }
 0x1cd   : >> { %553 = vtanh.f32 %v325_v55 }
 0x1ce   : >> { %v313_v56 = vpop.permute.xlu1 %312  ;;  %v323_v57 = vpop.permute.xlu0 %322 }
 0x1cf   : >> { %v326_v58 = vadd.f32 %v313_v56, %v801_v18  ;;  %v328_v59 = vadd.f32 %v323_v57, %v807_v25 }
 0x1d1   : >> { %555 = vtanh.f32 %v326_v58 }
 0x1d2   : >> { %v318_v60 = vpop.permute.xlu1 %317  ;;  %557 = vtanh.f32 %v328_v59 }
 0x1d3   : >> { %v327_v61 = vadd.f32 %v318_v60, %v805_v24 }
 0x1d5   : >> { %559 = vtanh.f32 %v327_v61 }
 0x1d7   : >> { %v554_v62 = vpop.eup %553  ;;  %v364_v43 = vpop.permute.xlu1 %363 }
 0x1d8   : >> { %v333_v7 = vmul.f32 %v554_v62, %v809_v26  ;;  %v346_v9 = vmul.f32 %v554_v62, %v815_v29 }
 0x1db   : >> { %v556_v63 = vpop.eup %555 }
 0x1dc   : >> { %v334_v2 = vmul.f32 %v556_v63, %v811_v27  ;;  %v347_v5 = vmul.f32 %v556_v63, %v821_v32  ;;  %v558_v6 = vpop.eup %557 }
 0x1dd   : >> { %v336_v15 = vmul.f32 %v558_v6, %v817_v30  ;;  %v349_v16 = vmul.f32 %v558_v6, %v819_v31 }
 0x1de   : >> { %v337_v11 = vadd.f32 %v334_v2, %v333_v7  ;;  %v350_v12 = vadd.f32 %v347_v5, %v346_v9 }
 0x1df   : >> { %v560_v10 = vpop.eup %559 }
 0x1e0   : >> { %v335_v13 = vmul.f32 %v560_v10, %v813_v28  ;;  %v348_v14 = vmul.f32 %v560_v10, %v823_v33 }
 0x1e2   : >> { %v338_v17 = vadd.f32 %v337_v11, %v335_v13  ;;  %v351_v20 = vadd.f32 %v350_v12, %v348_v14 }
 0x1e4   : >> { %v339_v21 = vadd.f32 %v338_v17, %v336_v15  ;;  %v352_v22 = vadd.f32 %v351_v20, %v349_v16 }
 0x1e6   : >> { %v340_v23 = vrot.slane %v339_v21, 4  ;;  %v353_v34 = vrot.slane %v352_v22, 4 }
 0x1e8   : >> { %v341_v35 = vadd.f32 %v340_v23, %v339_v21  ;;  %v354_v36 = vadd.f32 %v353_v34, %v352_v22 }
 0x1ea   : >> { %v342_v37 = vrot.slane %v341_v35, 2  ;;  %v355_v38 = vrot.slane %v354_v36, 2 }
 0x1ec   : >> { %v343_v39 = vadd.f32 %v342_v37, %v341_v35  ;;  %v356_v40 = vadd.f32 %v355_v38, %v354_v36 }
 0x1ee   : >> { %v344_v41 = vrot.slane %v343_v39, 1  ;;  %v357_v42 = vrot.slane %v356_v40, 1 }
 0x1ef   : > { %269 = sbr.rel (!%p267_p10) target bundleno = 203 (0xcb), region = 80 }
 0x1f0   : >> { %v345_v44 = vadd.f32 %v344_v41, %v343_v39  ;;  %v358_v45 = vadd.f32 %v357_v42, %v356_v40 }
 0x1f2   : >> { %v360_v46 = vsel %vm359_vm0, %v345_v44, %v358_v45 }
 0x1f3   : >> { %v366_v47 = vadd.f32 %v364_v43, %v360_v46 }
 0x1f5   : >> { %368 = vst [vmem:[%s367_s8] sm:$0x3] %v366_v47 }
 0x1f6   : > { %589 = shalt.err (!%p586_p3)
}
 0x1f7   : > { %s590_s11 = scalar_lea.hbm %s867_s20, 256  ;;  %s594_s30 = scalar_lea.hbm %s919_s3, 512 }
 0x1f8   : > { %p591_p4 = scmp.ne.s32.totalorder %s867_s20, %s590_s11  ;;  %p595_p9 = scmp.lt.u32.totalorder %s867_s20, %s919_s3 }
 0x1f9   : > { %p596_p10 = scmp.lt.u32.totalorder %s594_s30, %s590_s11  ;;  %p598_p12 = scmp.lt.u32.totalorder %s590_s11, %s867_s20 }
 0x1fa   : > { %p592_p7 = pnand %p591_p4, %p722_p5 }
 0x1fb   : > { %p597_p11 = por %p596_p10, %p595_p9 }
 0x1fc   : > { %p593_p8 = pneg %p592_p7 }
 0x1fd   : > { %p599_p13 = por %p598_p12, %p597_p11 }
 0x1ff   : > { %p600_p0 = pnand %p599_p13, %p593_p8 }
 0x201   : > { %603 = shalt.err (!%p600_p0)
}
 0x202   : > { %s661_s6 = smov 32   ;;  %s662_s7 = smov 64  }
 0x203   : > { %s663_s8 = smov 2  }
 0x204   : > { %477 = dma.vmem_to_hbm [thread:$0]  (%p722_p5), %s871_s24, 256, %s867_s20, %s875_s25, %s661_s6, %s662_s7, %s663_s8  }
 0x205 PF: > { %p489_p1 = scmp.ge.s32.totalorder %s646_s15, 2  ;;  %s397_s9 = sand.u32 1, %s634_s12  }
 0x206   : > { %s398_s10 = scalar_lea.sflag [#allocation3], %s397_s9 }
 0x207   : > { %p484_p2 = pnand %p489_p1, %p726_p6 }
 0x209   : > { %629 = dma.done.wait (!%p484_p2), %s398_s10, 256  }
 0x20a   : > { %631 = vsyncadd (!%p484_p2), %s398_s10, 4294967040  ;;  %p14_p3 = scmp.ge.s32.totalorder %s709_s18, 4   ;;  %s923_s12 = smov %s638_s13 }
 0x20b   : > { %s924_s13 = smov %s642_s14  ;;  %s925_s14 = smov %s720_s21 }
 0x20c   : > { %s926_s15 = smov %s709_s18  ;;  %16 = sbr.rel (!%p14_p3) target bundleno = 4 (0x4), region = 91 }
 0x213   :  { %403 = vsyncpa [#allocation3], 1 }
 0x214   :  { %405 = vsyncpa [#allocation3 + $0x1], 1 }
 0x215   :  { %406 = vsyncpa [#allocation4], 1 }
 0x216   :  { %408 = vsyncpa [#allocation4 + $0x1], 1 }

</bundles_post_ra>
